<compile_context>
chip_gen: v7x
topology: tpu7x:2x2x1
jax: 0.10.0
libtpu: 0.0.40
codegen_flags: <defaults>
</compile_context>

<pallas_src>
import math
import functools

import jax
import jax.numpy as jnp
from jax.experimental import pallas as pl
from jax.experimental.pallas import tpu as pltpu


def _round_up(x, m):
    return (x + m - 1) // m * m


def _c_lstm_kernel(seq_sz, HS, G, unroll, mxu_dtype,
                   pregates_ref, u_ref,
                   hseq_ref, h_ref, c_ref):
    """Single-invocation kernel; the whole time recurrence runs in-kernel.

    Packed layout: gate k (k = 0:i, 1:f, 2:g, 3:o) occupies lanes
    [k*G, k*G + HS) of the 4*G-wide gate axis; lanes [k*G+HS, (k+1)*G) are
    zero-padded pre-activations.  State (h, c) is kept 4*G lanes wide with only
    lanes [0, HS) meaningful; the extra lanes hold bounded, deterministic
    values that never feed back into real lanes (U rows >= HS are zero).

    pregates_ref: (seq, bs_p, 4*G)  precomputed x@W + bias (+ td@Q in f/o)
    u_ref:        (4*G, 4*G)        recurrent weight (rows >= HS zero)
    hseq_ref:     (seq, bs_p, 4*G)  per-step hidden states (time-major)
    h_ref, c_ref: (bs_p, 4*G)       final-state outputs
    """
    Hp4 = 4 * G
    bs_p = h_ref.shape[0]

    # Hoisted out of the recurrence: loaded / built once.
    u = u_ref[...]
    lane = jax.lax.broadcasted_iota(jnp.int32, (bs_p, Hp4), 1)
    is_g = jnp.logical_and(lane >= 2 * G, lane < 3 * G)
    # sigmoid(x) = 0.5 * (1 + tanh(x / 2)); fuse with tanh(g) via lane mask so
    # the packed gate vreg needs a single EUP tanh pass.
    scale = jnp.where(is_g, jnp.float32(1.0), jnp.float32(0.5))
    offset = jnp.where(is_g, jnp.float32(0.0), jnp.float32(0.5))

    def step(t, carry):
        h_t, c_t = carry
        # Single per-step MXU matmul: (bs_p, 4G) @ (4G, 4G); rows >= HS of u
        # are zero so the padding lanes of h_t contribute nothing.
        gates = pregates_ref[t] + jnp.dot(
            h_t.astype(mxu_dtype), u, preferred_element_type=jnp.float32)
        tg = jnp.tanh(gates * scale)
        act = tg * scale + offset          # [i | f | g | o] activations, packed
        # Align f / g / o gate blocks with lanes [0, HS) (XLU rotations).
        f_a = pltpu.roll(act, 3 * G, 1)
        g_a = pltpu.roll(act, 2 * G, 1)
        o_a = pltpu.roll(act, 1 * G, 1)
        c_new = f_a * c_t + act * g_a      # act's block 0 is i
        h_new = o_a * jnp.tanh(c_new)
        hseq_ref[t] = h_new
        return (h_new, c_new)

    zeros = jnp.zeros((bs_p, Hp4), jnp.float32)
    h_T, c_T = jax.lax.fori_loop(0, seq_sz, step, (zeros, zeros), unroll=unroll)
    h_ref[...] = h_T
    c_ref[...] = c_T


def c_lstm_forward(events, raw_time_gap, params, *, hidden_size, timedecay_size,
                   model_time="forget", mxu_dtype=jnp.float32):
    """Pallas implementation of C_LSTM.forward (zero initial states).

    events:       (bs, seq, feat) float32
    raw_time_gap: (bs, seq)       float32
    Returns (hidden_seq (bs, seq, H), (h_T (bs, H), c_T (bs, H)))
    """
    if model_time not in ("forget", "output", "forget_output"):
        raise ValueError(
            "model_time should be one of ['output', 'forget_output', 'forget']")

    W, U, Q, bias = params["W"], params["U"], params["Q"], params["bias"]
    bs, seq_sz, _ = events.shape
    HS = hidden_size
    Td = timedecay_size

    # --- reproduce the (quirky) PyTorch timedecay construction exactly ---
    # torch.cat([timedecay**i for i in 1..Td], dim=0).reshape(bs, seq, -1)
    td_cat = jnp.concatenate([raw_time_gap ** i for i in range(1, Td + 1)], axis=0)
    timedecay = td_cat.reshape(bs, seq_sz, Td)

    # --- hoist all non-recurrent gate terms: one batched matmul over the seq ---
    x = events[:, :, 0:1].astype(jnp.float32)                 # (bs, seq, 1)
    pregates = x @ W + bias.reshape(1, 1, 4 * HS)             # (bs, seq, 4H)
    tdq = timedecay.astype(jnp.float32) @ Q                   # (bs, seq, H)
    pre4 = pregates.reshape(bs, seq_sz, 4, HS)
    if model_time in ("forget", "forget_output"):
        pre4 = pre4.at[:, :, 1, :].add(tdq)                   # fold into f gate
    if model_time in ("output", "forget_output"):
        pre4 = pre4.at[:, :, 3, :].add(tdq)                   # fold into o gate

    # --- packed, hardware-friendly layout ---
    # batch -> multiple of 8 (sublane); per-gate width -> G = round_up(HS, 32)
    # so the total gate width 4*G is a multiple of 128 (lane-dense, minimal).
    bs_p = _round_up(bs, 8)
    G = _round_up(HS, 32)
    Hp4 = 4 * G

    pre4 = jnp.pad(pre4, ((0, bs_p - bs), (0, 0), (0, 0), (0, G - HS)))
    pregates_tm = jnp.transpose(
        pre4.reshape(bs_p, seq_sz, Hp4), (1, 0, 2))            # (seq, bs_p, 4G)

    # U: (HS, 4*HS) -> (4G, 4G); rows >= HS and per-gate pad columns are zero.
    U4 = U.reshape(HS, 4, HS)
    U_pad = jnp.pad(U4, ((0, Hp4 - HS), (0, 0), (0, G - HS))).reshape(Hp4, Hp4)
    U_pad = U_pad.astype(mxu_dtype)

    # Integer unroll factor: full unroll for short sequences, partial otherwise.
    if seq_sz <= 16:
        unroll = seq_sz
    else:
        unroll = next(d for d in (8, 4, 2, 1) if seq_sz % d == 0)

    kernel = functools.partial(_c_lstm_kernel, seq_sz, HS, G, unroll, mxu_dtype)

    vmem_spec = pl.BlockSpec(memory_space=pltpu.MemorySpace.VMEM)

    # Raise the scoped VMEM limit only when the resident footprint needs it
    # (long sequences on v5e/v6e; on v7x prefer time-chunked HBM streaming).
    vmem_bytes = (pregates_tm.size * 4 + U_pad.size * U_pad.dtype.itemsize
                  + seq_sz * bs_p * Hp4 * 4 + 2 * bs_p * Hp4 * 4)
    compiler_params = None
    if vmem_bytes > (12 << 20):
        compiler_params = pltpu.CompilerParams(
            vmem_limit_bytes=int(min(2 * vmem_bytes, 100 << 20)))

    hseq_tm, h_T, c_T = pl.pallas_call(
        kernel,
        out_shape=(
            jax.ShapeDtypeStruct((seq_sz, bs_p, Hp4), jnp.float32),
            jax.ShapeDtypeStruct((bs_p, Hp4), jnp.float32),
            jax.ShapeDtypeStruct((bs_p, Hp4), jnp.float32),
        ),
        in_specs=[vmem_spec, vmem_spec],
        out_specs=(vmem_spec, vmem_spec, vmem_spec),
        compiler_params=compiler_params,
    )(pregates_tm, U_pad)

    hidden_seq = jnp.transpose(hseq_tm[:, :bs, :HS], (1, 0, 2))   # (bs, seq, HS)
    return hidden_seq, (h_T[:bs, :HS], c_T[:bs, :HS])


def _reference_forward(events, raw_time_gap, params, *, hidden_size,
                       timedecay_size, model_time="forget"):
    """Pure-JAX reference mirroring the PyTorch loop (for verification)."""
    W, U, Q, bias = params["W"], params["U"], params["Q"], params["bias"]
    bs, seq_sz, _ = events.shape
    HS = hidden_size
    Td = timedecay_size
    td_cat = jnp.concatenate([raw_time_gap ** i for i in range(1, Td + 1)], axis=0)
    timedecay = td_cat.reshape(bs, seq_sz, Td)

    h_t = jnp.zeros((bs, HS), jnp.float32)
    c_t = jnp.zeros((bs, HS), jnp.float32)
    hs = []
    for t in range(seq_sz):
        x_t = events[:, t, 0:1]
        gates = x_t @ W + h_t @ U + bias
        tdq = timedecay[:, t, :] @ Q
        i_pre = gates[:, :HS]
        f_pre = gates[:, HS:2 * HS]
        g_pre = gates[:, 2 * HS:3 * HS]
        o_pre = gates[:, 3 * HS:]
        if model_time in ("forget", "forget_output"):
            f_pre = f_pre + tdq
        if model_time in ("output", "forget_output"):
            o_pre = o_pre + tdq
        i_t = jax.nn.sigmoid(i_pre)
        f_t = jax.nn.sigmoid(f_pre)
        g_t = jnp.tanh(g_pre)
        o_t = jax.nn.sigmoid(o_pre)
        c_t = f_t * c_t + i_t * g_t
        h_t = o_t * jnp.tanh(c_t)
        hs.append(h_t)
    return jnp.stack(hs, axis=1), (h_t, c_t)


if __name__ == "__main__":
    # config
    hidden_size = 32
    timedecay_size = 3
    model_time = "forget"
    bs, seq_sz, feat = 2, 8, 4

    key = jax.random.PRNGKey(0)
    k_ev, k_td, kW, kU, kQ, kb = jax.random.split(key, 6)

    # deterministic parameter init: uniform(-stdv, stdv), stdv = 1/sqrt(H)
    stdv = 1.0 / math.sqrt(hidden_size)
    params = {
        "W": jax.random.uniform(kW, (1, hidden_size * 4), jnp.float32, -stdv, stdv),
        "U": jax.random.uniform(kU, (hidden_size, hidden_size * 4), jnp.float32, -stdv, stdv),
        "Q": jax.random.uniform(kQ, (timedecay_size, hidden_size), jnp.float32, -stdv, stdv),
        "bias": jax.random.uniform(kb, (hidden_size * 4,), jnp.float32, -stdv, stdv),
    }

    events = jax.random.normal(k_ev, (bs, seq_sz, feat), jnp.float32)
    raw_time_gap = jax.random.uniform(k_td, (bs, seq_sz), jnp.float32, 0.0, 2.0)

    hidden_seq, (h_T, c_T) = c_lstm_forward(
        events, raw_time_gap, params,
        hidden_size=hidden_size, timedecay_size=timedecay_size,
        model_time=model_time)
    jax.block_until_ready((hidden_seq, h_T, c_T))

    # verify against pure-JAX reference of the PyTorch loop
    ref_seq, (ref_h, ref_c) = _reference_forward(
        events, raw_time_gap, params,
        hidden_size=hidden_size, timedecay_size=timedecay_size,
        model_time=model_time)

    assert hidden_seq.shape == (bs, seq_sz, hidden_size)
    assert jnp.allclose(hidden_seq, ref_seq, atol=1e-5, rtol=1e-5)
    assert jnp.allclose(h_T, ref_h, atol=1e-5, rtol=1e-5)
    assert jnp.allclose(c_T, ref_c, atol=1e-5, rtol=1e-5)

    print("KERNEL_OK")
</pallas_src>

<mosaic_0001>
module attributes {stable_mosaic.version = 11 : i64} {
  func.func @_c_lstm_kernel(%arg0: memref<8x8x128xf32, #tpu.memory_space<vmem>>, %arg1: memref<128x128xf32, #tpu.memory_space<vmem>>, %arg2: memref<8x8x128xf32, #tpu.memory_space<vmem>>, %arg3: memref<8x128xf32, #tpu.memory_space<vmem>>, %arg4: memref<8x128xf32, #tpu.memory_space<vmem>>) attributes {dimension_semantics = [], scalar_prefetch = 0 : i64, scratch_operands = 0 : i64, tpu.core_type = #tpu.core_type<tc>} {
    %c0 = arith.constant 0 : index
    %c0_0 = arith.constant 0 : index
    %0 = vector.load %arg1[%c0, %c0_0] : memref<128x128xf32, #tpu.memory_space<vmem>>, vector<128x128xf32>
    %1 = tpu.iota {dimensions = array<i32: 1>} : vector<8x128xi32>
    %c64_i32 = arith.constant 64 : i32
    %2 = vector.broadcast %c64_i32 : i32 to vector<8x128xi32>
    %3 = arith.cmpi sge, %1, %2 : vector<8x128xi32>
    %c96_i32 = arith.constant 96 : i32
    %4 = vector.broadcast %c96_i32 : i32 to vector<8x128xi32>
    %5 = arith.cmpi slt, %1, %4 : vector<8x128xi32>
    %6 = arith.andi %3, %5 : vector<8x128xi1>
    %cst = arith.constant 1.000000e+00 : f32
    %cst_1 = arith.constant 5.000000e-01 : f32
    %7 = vector.broadcast %cst : f32 to vector<8x128xf32>
    %8 = vector.broadcast %cst_1 : f32 to vector<8x128xf32>
    %9 = arith.select %6, %7, %8 : vector<8x128xi1>, vector<8x128xf32>
    %cst_2 = arith.constant 0.000000e+00 : f32
    %cst_3 = arith.constant 5.000000e-01 : f32
    %10 = vector.broadcast %cst_2 : f32 to vector<8x128xf32>
    %11 = vector.broadcast %cst_3 : f32 to vector<8x128xf32>
    %12 = arith.select %6, %10, %11 : vector<8x128xi1>, vector<8x128xf32>
    %cst_4 = arith.constant 0.000000e+00 : f32
    %13 = vector.broadcast %cst_4 : f32 to vector<8x128xf32>
    %c0_i32 = arith.constant 0 : i32
    %14 = arith.index_cast %c0_i32 : i32 to index
    %c0_5 = arith.constant 0 : index
    %c0_6 = arith.constant 0 : index
    %15 = vector.load %arg0[%14, %c0_5, %c0_6] : memref<8x8x128xf32, #tpu.memory_space<vmem>>, vector<1x8x128xf32>
    %16 = vector.shape_cast %15 : vector<1x8x128xf32> to vector<8x128xf32>
    %cst_7 = arith.constant dense<0.000000e+00> : vector<8x128xf32>
    %17 = tpu.matmul %13, %0, %cst_7 {dimension_numbers = #tpu.dot_dimension_numbers<[1], [0], [0], [1], [0, 0, 1, 1], [], []>} : vector<8x128xf32>, vector<128x128xf32>, vector<8x128xf32> -> vector<8x128xf32>
    %18 = arith.addf %16, %17 : vector<8x128xf32>
    %19 = arith.mulf %18, %9 : vector<8x128xf32>
    %20 = math.tanh %19 : vector<8x128xf32>
    %21 = arith.mulf %20, %9 : vector<8x128xf32>
    %22 = arith.addf %21, %12 : vector<8x128xf32>
    %c96_i32_8 = arith.constant 96 : i32
    %23 = tpu.dynamic_rotate %22 by %c96_i32_8 dim 1 : vector<8x128xf32>, i32 -> vector<8x128xf32>
    %c64_i32_9 = arith.constant 64 : i32
    %24 = tpu.dynamic_rotate %22 by %c64_i32_9 dim 1 : vector<8x128xf32>, i32 -> vector<8x128xf32>
    %c32_i32 = arith.constant 32 : i32
    %25 = tpu.dynamic_rotate %22 by %c32_i32 dim 1 : vector<8x128xf32>, i32 -> vector<8x128xf32>
    %26 = arith.mulf %23, %13 : vector<8x128xf32>
    %27 = arith.mulf %22, %24 : vector<8x128xf32>
    %28 = arith.addf %26, %27 : vector<8x128xf32>
    %29 = math.tanh %28 : vector<8x128xf32>
    %30 = arith.mulf %25, %29 : vector<8x128xf32>
    %31 = arith.index_cast %c0_i32 : i32 to index
    %c0_10 = arith.constant 0 : index
    %c0_11 = arith.constant 0 : index
    %32 = vector.load %arg2[%31, %c0_10, %c0_11] : memref<8x8x128xf32, #tpu.memory_space<vmem>>, vector<1x8x128xf32>
    %33 = vector.shape_cast %32 : vector<1x8x128xf32> to vector<8x128xf32>
    %34 = vector.shape_cast %30 : vector<8x128xf32> to vector<1x8x128xf32>
    tpu.vector_store %arg2[%31, %c0_10, %c0_11], %34 {strides = array<i32>} : memref<8x8x128xf32, #tpu.memory_space<vmem>>, vector<1x8x128xf32>,
    %c1_i32 = arith.constant 1 : i32
    %35 = arith.index_cast %c1_i32 : i32 to index
    %c0_12 = arith.constant 0 : index
    %c0_13 = arith.constant 0 : index
    %36 = vector.load %arg0[%35, %c0_12, %c0_13] : memref<8x8x128xf32, #tpu.memory_space<vmem>>, vector<1x8x128xf32>
    %37 = vector.shape_cast %36 : vector<1x8x128xf32> to vector<8x128xf32>
    %cst_14 = arith.constant dense<0.000000e+00> : vector<8x128xf32>
    %38 = tpu.matmul %30, %0, %cst_14 {dimension_numbers = #tpu.dot_dimension_numbers<[1], [0], [0], [1], [0, 0, 1, 1], [], []>} : vector<8x128xf32>, vector<128x128xf32>, vector<8x128xf32> -> vector<8x128xf32>
    %39 = arith.addf %37, %38 : vector<8x128xf32>
    %40 = arith.mulf %39, %9 : vector<8x128xf32>
    %41 = math.tanh %40 : vector<8x128xf32>
    %42 = arith.mulf %41, %9 : vector<8x128xf32>
    %43 = arith.addf %42, %12 : vector<8x128xf32>
    %c96_i32_15 = arith.constant 96 : i32
    %44 = tpu.dynamic_rotate %43 by %c96_i32_15 dim 1 : vector<8x128xf32>, i32 -> vector<8x128xf32>
    %c64_i32_16 = arith.constant 64 : i32
    %45 = tpu.dynamic_rotate %43 by %c64_i32_16 dim 1 : vector<8x128xf32>, i32 -> vector<8x128xf32>
    %c32_i32_17 = arith.constant 32 : i32
    %46 = tpu.dynamic_rotate %43 by %c32_i32_17 dim 1 : vector<8x128xf32>, i32 -> vector<8x128xf32>
    %47 = arith.mulf %44, %28 : vector<8x128xf32>
    %48 = arith.mulf %43, %45 : vector<8x128xf32>
    %49 = arith.addf %47, %48 : vector<8x128xf32>
    %50 = math.tanh %49 : vector<8x128xf32>
    %51 = arith.mulf %46, %50 : vector<8x128xf32>
    %52 = arith.index_cast %c1_i32 : i32 to index
    %c0_18 = arith.constant 0 : index
    %c0_19 = arith.constant 0 : index
    %53 = vector.load %arg2[%52, %c0_18, %c0_19] : memref<8x8x128xf32, #tpu.memory_space<vmem>>, vector<1x8x128xf32>
    %54 = vector.shape_cast %53 : vector<1x8x128xf32> to vector<8x128xf32>
    %55 = vector.shape_cast %51 : vector<8x128xf32> to vector<1x8x128xf32>
    tpu.vector_store %arg2[%52, %c0_18, %c0_19], %55 {strides = array<i32>} : memref<8x8x128xf32, #tpu.memory_space<vmem>>, vector<1x8x128xf32>,
    %c2_i32 = arith.constant 2 : i32
    %56 = arith.index_cast %c2_i32 : i32 to index
    %c0_20 = arith.constant 0 : index
    %c0_21 = arith.constant 0 : index
    %57 = vector.load %arg0[%56, %c0_20, %c0_21] : memref<8x8x128xf32, #tpu.memory_space<vmem>>, vector<1x8x128xf32>
    %58 = vector.shape_cast %57 : vector<1x8x128xf32> to vector<8x128xf32>
    %cst_22 = arith.constant dense<0.000000e+00> : vector<8x128xf32>
    %59 = tpu.matmul %51, %0, %cst_22 {dimension_numbers = #tpu.dot_dimension_numbers<[1], [0], [0], [1], [0, 0, 1, 1], [], []>} : vector<8x128xf32>, vector<128x128xf32>, vector<8x128xf32> -> vector<8x128xf32>
    %60 = arith.addf %58, %59 : vector<8x128xf32>
    %61 = arith.mulf %60, %9 : vector<8x128xf32>
    %62 = math.tanh %61 : vector<8x128xf32>
    %63 = arith.mulf %62, %9 : vector<8x128xf32>
    %64 = arith.addf %63, %12 : vector<8x128xf32>
    %c96_i32_23 = arith.constant 96 : i32
    %65 = tpu.dynamic_rotate %64 by %c96_i32_23 dim 1 : vector<8x128xf32>, i32 -> vector<8x128xf32>
    %c64_i32_24 = arith.constant 64 : i32
    %66 = tpu.dynamic_rotate %64 by %c64_i32_24 dim 1 : vector<8x128xf32>, i32 -> vector<8x128xf32>
    %c32_i32_25 = arith.constant 32 : i32
    %67 = tpu.dynamic_rotate %64 by %c32_i32_25 dim 1 : vector<8x128xf32>, i32 -> vector<8x128xf32>
    %68 = arith.mulf %65, %49 : vector<8x128xf32>
    %69 = arith.mulf %64, %66 : vector<8x128xf32>
    %70 = arith.addf %68, %69 : vector<8x128xf32>
    %71 = math.tanh %70 : vector<8x128xf32>
    %72 = arith.mulf %67, %71 : vector<8x128xf32>
    %73 = arith.index_cast %c2_i32 : i32 to index
    %c0_26 = arith.constant 0 : index
    %c0_27 = arith.constant 0 : index
    %74 = vector.load %arg2[%73, %c0_26, %c0_27] : memref<8x8x128xf32, #tpu.memory_space<vmem>>, vector<1x8x128xf32>
    %75 = vector.shape_cast %74 : vector<1x8x128xf32> to vector<8x128xf32>
    %76 = vector.shape_cast %72 : vector<8x128xf32> to vector<1x8x128xf32>
    tpu.vector_store %arg2[%73, %c0_26, %c0_27], %76 {strides = array<i32>} : memref<8x8x128xf32, #tpu.memory_space<vmem>>, vector<1x8x128xf32>,
    %c3_i32 = arith.constant 3 : i32
    %77 = arith.index_cast %c3_i32 : i32 to index
    %c0_28 = arith.constant 0 : index
    %c0_29 = arith.constant 0 : index
    %78 = vector.load %arg0[%77, %c0_28, %c0_29] : memref<8x8x128xf32, #tpu.memory_space<vmem>>, vector<1x8x128xf32>
    %79 = vector.shape_cast %78 : vector<1x8x128xf32> to vector<8x128xf32>
    %cst_30 = arith.constant dense<0.000000e+00> : vector<8x128xf32>
    %80 = tpu.matmul %72, %0, %cst_30 {dimension_numbers = #tpu.dot_dimension_numbers<[1], [0], [0], [1], [0, 0, 1, 1], [], []>} : vector<8x128xf32>, vector<128x128xf32>, vector<8x128xf32> -> vector<8x128xf32>
    %81 = arith.addf %79, %80 : vector<8x128xf32>
    %82 = arith.mulf %81, %9 : vector<8x128xf32>
    %83 = math.tanh %82 : vector<8x128xf32>
    %84 = arith.mulf %83, %9 : vector<8x128xf32>
    %85 = arith.addf %84, %12 : vector<8x128xf32>
    %c96_i32_31 = arith.constant 96 : i32
    %86 = tpu.dynamic_rotate %85 by %c96_i32_31 dim 1 : vector<8x128xf32>, i32 -> vector<8x128xf32>
    %c64_i32_32 = arith.constant 64 : i32
    %87 = tpu.dynamic_rotate %85 by %c64_i32_32 dim 1 : vector<8x128xf32>, i32 -> vector<8x128xf32>
    %c32_i32_33 = arith.constant 32 : i32
    %88 = tpu.dynamic_rotate %85 by %c32_i32_33 dim 1 : vector<8x128xf32>, i32 -> vector<8x128xf32>
    %89 = arith.mulf %86, %70 : vector<8x128xf32>
    %90 = arith.mulf %85, %87 : vector<8x128xf32>
    %91 = arith.addf %89, %90 : vector<8x128xf32>
    %92 = math.tanh %91 : vector<8x128xf32>
    %93 = arith.mulf %88, %92 : vector<8x128xf32>
    %94 = arith.index_cast %c3_i32 : i32 to index
    %c0_34 = arith.constant 0 : index
    %c0_35 = arith.constant 0 : index
    %95 = vector.load %arg2[%94, %c0_34, %c0_35] : memref<8x8x128xf32, #tpu.memory_space<vmem>>, vector<1x8x128xf32>
    %96 = vector.shape_cast %95 : vector<1x8x128xf32> to vector<8x128xf32>
    %97 = vector.shape_cast %93 : vector<8x128xf32> to vector<1x8x128xf32>
    tpu.vector_store %arg2[%94, %c0_34, %c0_35], %97 {strides = array<i32>} : memref<8x8x128xf32, #tpu.memory_space<vmem>>, vector<1x8x128xf32>,
    %c4_i32 = arith.constant 4 : i32
    %98 = arith.index_cast %c4_i32 : i32 to index
    %c0_36 = arith.constant 0 : index
    %c0_37 = arith.constant 0 : index
    %99 = vector.load %arg0[%98, %c0_36, %c0_37] : memref<8x8x128xf32, #tpu.memory_space<vmem>>, vector<1x8x128xf32>
    %100 = vector.shape_cast %99 : vector<1x8x128xf32> to vector<8x128xf32>
    %cst_38 = arith.constant dense<0.000000e+00> : vector<8x128xf32>
    %101 = tpu.matmul %93, %0, %cst_38 {dimension_numbers = #tpu.dot_dimension_numbers<[1], [0], [0], [1], [0, 0, 1, 1], [], []>} : vector<8x128xf32>, vector<128x128xf32>, vector<8x128xf32> -> vector<8x128xf32>
    %102 = arith.addf %100, %101 : vector<8x128xf32>
    %103 = arith.mulf %102, %9 : vector<8x128xf32>
    %104 = math.tanh %103 : vector<8x128xf32>
    %105 = arith.mulf %104, %9 : vector<8x128xf32>
    %106 = arith.addf %105, %12 : vector<8x128xf32>
    %c96_i32_39 = arith.constant 96 : i32
    %107 = tpu.dynamic_rotate %106 by %c96_i32_39 dim 1 : vector<8x128xf32>, i32 -> vector<8x128xf32>
    %c64_i32_40 = arith.constant 64 : i32
    %108 = tpu.dynamic_rotate %106 by %c64_i32_40 dim 1 : vector<8x128xf32>, i32 -> vector<8x128xf32>
    %c32_i32_41 = arith.constant 32 : i32
    %109 = tpu.dynamic_rotate %106 by %c32_i32_41 dim 1 : vector<8x128xf32>, i32 -> vector<8x128xf32>
    %110 = arith.mulf %107, %91 : vector<8x128xf32>
    %111 = arith.mulf %106, %108 : vector<8x128xf32>
    %112 = arith.addf %110, %111 : vector<8x128xf32>
    %113 = math.tanh %112 : vector<8x128xf32>
    %114 = arith.mulf %109, %113 : vector<8x128xf32>
    %115 = arith.index_cast %c4_i32 : i32 to index
    %c0_42 = arith.constant 0 : index
    %c0_43 = arith.constant 0 : index
    %116 = vector.load %arg2[%115, %c0_42, %c0_43] : memref<8x8x128xf32, #tpu.memory_space<vmem>>, vector<1x8x128xf32>
    %117 = vector.shape_cast %116 : vector<1x8x128xf32> to vector<8x128xf32>
    %118 = vector.shape_cast %114 : vector<8x128xf32> to vector<1x8x128xf32>
    tpu.vector_store %arg2[%115, %c0_42, %c0_43], %118 {strides = array<i32>} : memref<8x8x128xf32, #tpu.memory_space<vmem>>, vector<1x8x128xf32>,
    %c5_i32 = arith.constant 5 : i32
    %119 = arith.index_cast %c5_i32 : i32 to index
    %c0_44 = arith.constant 0 : index
    %c0_45 = arith.constant 0 : index
    %120 = vector.load %arg0[%119, %c0_44, %c0_45] : memref<8x8x128xf32, #tpu.memory_space<vmem>>, vector<1x8x128xf32>
    %121 = vector.shape_cast %120 : vector<1x8x128xf32> to vector<8x128xf32>
    %cst_46 = arith.constant dense<0.000000e+00> : vector<8x128xf32>
    %122 = tpu.matmul %114, %0, %cst_46 {dimension_numbers = #tpu.dot_dimension_numbers<[1], [0], [0], [1], [0, 0, 1, 1], [], []>} : vector<8x128xf32>, vector<128x128xf32>, vector<8x128xf32> -> vector<8x128xf32>
    %123 = arith.addf %121, %122 : vector<8x128xf32>
    %124 = arith.mulf %123, %9 : vector<8x128xf32>
    %125 = math.tanh %124 : vector<8x128xf32>
    %126 = arith.mulf %125, %9 : vector<8x128xf32>
    %127 = arith.addf %126, %12 : vector<8x128xf32>
    %c96_i32_47 = arith.constant 96 : i32
    %128 = tpu.dynamic_rotate %127 by %c96_i32_47 dim 1 : vector<8x128xf32>, i32 -> vector<8x128xf32>
    %c64_i32_48 = arith.constant 64 : i32
    %129 = tpu.dynamic_rotate %127 by %c64_i32_48 dim 1 : vector<8x128xf32>, i32 -> vector<8x128xf32>
    %c32_i32_49 = arith.constant 32 : i32
    %130 = tpu.dynamic_rotate %127 by %c32_i32_49 dim 1 : vector<8x128xf32>, i32 -> vector<8x128xf32>
    %131 = arith.mulf %128, %112 : vector<8x128xf32>
    %132 = arith.mulf %127, %129 : vector<8x128xf32>
    %133 = arith.addf %131, %132 : vector<8x128xf32>
    %134 = math.tanh %133 : vector<8x128xf32>
    %135 = arith.mulf %130, %134 : vector<8x128xf32>
    %136 = arith.index_cast %c5_i32 : i32 to index
    %c0_50 = arith.constant 0 : index
    %c0_51 = arith.constant 0 : index
    %137 = vector.load %arg2[%136, %c0_50, %c0_51] : memref<8x8x128xf32, #tpu.memory_space<vmem>>, vector<1x8x128xf32>
    %138 = vector.shape_cast %137 : vector<1x8x128xf32> to vector<8x128xf32>
    %139 = vector.shape_cast %135 : vector<8x128xf32> to vector<1x8x128xf32>
    tpu.vector_store %arg2[%136, %c0_50, %c0_51], %139 {strides = array<i32>} : memref<8x8x128xf32, #tpu.memory_space<vmem>>, vector<1x8x128xf32>,
    %c6_i32 = arith.constant 6 : i32
    %140 = arith.index_cast %c6_i32 : i32 to index
    %c0_52 = arith.constant 0 : index
    %c0_53 = arith.constant 0 : index
    %141 = vector.load %arg0[%140, %c0_52, %c0_53] : memref<8x8x128xf32, #tpu.memory_space<vmem>>, vector<1x8x128xf32>
    %142 = vector.shape_cast %141 : vector<1x8x128xf32> to vector<8x128xf32>
    %cst_54 = arith.constant dense<0.000000e+00> : vector<8x128xf32>
    %143 = tpu.matmul %135, %0, %cst_54 {dimension_numbers = #tpu.dot_dimension_numbers<[1], [0], [0], [1], [0, 0, 1, 1], [], []>} : vector<8x128xf32>, vector<128x128xf32>, vector<8x128xf32> -> vector<8x128xf32>
    %144 = arith.addf %142, %143 : vector<8x128xf32>
    %145 = arith.mulf %144, %9 : vector<8x128xf32>
    %146 = math.tanh %145 : vector<8x128xf32>
    %147 = arith.mulf %146, %9 : vector<8x128xf32>
    %148 = arith.addf %147, %12 : vector<8x128xf32>
    %c96_i32_55 = arith.constant 96 : i32
    %149 = tpu.dynamic_rotate %148 by %c96_i32_55 dim 1 : vector<8x128xf32>, i32 -> vector<8x128xf32>
    %c64_i32_56 = arith.constant 64 : i32
    %150 = tpu.dynamic_rotate %148 by %c64_i32_56 dim 1 : vector<8x128xf32>, i32 -> vector<8x128xf32>
    %c32_i32_57 = arith.constant 32 : i32
    %151 = tpu.dynamic_rotate %148 by %c32_i32_57 dim 1 : vector<8x128xf32>, i32 -> vector<8x128xf32>
    %152 = arith.mulf %149, %133 : vector<8x128xf32>
    %153 = arith.mulf %148, %150 : vector<8x128xf32>
    %154 = arith.addf %152, %153 : vector<8x128xf32>
    %155 = math.tanh %154 : vector<8x128xf32>
    %156 = arith.mulf %151, %155 : vector<8x128xf32>
    %157 = arith.index_cast %c6_i32 : i32 to index
    %c0_58 = arith.constant 0 : index
    %c0_59 = arith.constant 0 : index
    %158 = vector.load %arg2[%157, %c0_58, %c0_59] : memref<8x8x128xf32, #tpu.memory_space<vmem>>, vector<1x8x128xf32>
    %159 = vector.shape_cast %158 : vector<1x8x128xf32> to vector<8x128xf32>
    %160 = vector.shape_cast %156 : vector<8x128xf32> to vector<1x8x128xf32>
    tpu.vector_store %arg2[%157, %c0_58, %c0_59], %160 {strides = array<i32>} : memref<8x8x128xf32, #tpu.memory_space<vmem>>, vector<1x8x128xf32>,
    %c7_i32 = arith.constant 7 : i32
    %161 = arith.index_cast %c7_i32 : i32 to index
    %c0_60 = arith.constant 0 : index
    %c0_61 = arith.constant 0 : index
    %162 = vector.load %arg0[%161, %c0_60, %c0_61] : memref<8x8x128xf32, #tpu.memory_space<vmem>>, vector<1x8x128xf32>
    %163 = vector.shape_cast %162 : vector<1x8x128xf32> to vector<8x128xf32>
    %cst_62 = arith.constant dense<0.000000e+00> : vector<8x128xf32>
    %164 = tpu.matmul %156, %0, %cst_62 {dimension_numbers = #tpu.dot_dimension_numbers<[1], [0], [0], [1], [0, 0, 1, 1], [], []>} : vector<8x128xf32>, vector<128x128xf32>, vector<8x128xf32> -> vector<8x128xf32>
    %165 = arith.addf %163, %164 : vector<8x128xf32>
    %166 = arith.mulf %165, %9 : vector<8x128xf32>
    %167 = math.tanh %166 : vector<8x128xf32>
    %168 = arith.mulf %167, %9 : vector<8x128xf32>
    %169 = arith.addf %168, %12 : vector<8x128xf32>
    %c96_i32_63 = arith.constant 96 : i32
    %170 = tpu.dynamic_rotate %169 by %c96_i32_63 dim 1 : vector<8x128xf32>, i32 -> vector<8x128xf32>
    %c64_i32_64 = arith.constant 64 : i32
    %171 = tpu.dynamic_rotate %169 by %c64_i32_64 dim 1 : vector<8x128xf32>, i32 -> vector<8x128xf32>
    %c32_i32_65 = arith.constant 32 : i32
    %172 = tpu.dynamic_rotate %169 by %c32_i32_65 dim 1 : vector<8x128xf32>, i32 -> vector<8x128xf32>
    %173 = arith.mulf %170, %154 : vector<8x128xf32>
    %174 = arith.mulf %169, %171 : vector<8x128xf32>
    %175 = arith.addf %173, %174 : vector<8x128xf32>
    %176 = math.tanh %175 : vector<8x128xf32>
    %177 = arith.mulf %172, %176 : vector<8x128xf32>
    %178 = arith.index_cast %c7_i32 : i32 to index
    %c0_66 = arith.constant 0 : index
    %c0_67 = arith.constant 0 : index
    %179 = vector.load %arg2[%178, %c0_66, %c0_67] : memref<8x8x128xf32, #tpu.memory_space<vmem>>, vector<1x8x128xf32>
    %180 = vector.shape_cast %179 : vector<1x8x128xf32> to vector<8x128xf32>
    %181 = vector.shape_cast %177 : vector<8x128xf32> to vector<1x8x128xf32>
    tpu.vector_store %arg2[%178, %c0_66, %c0_67], %181 {strides = array<i32>} : memref<8x8x128xf32, #tpu.memory_space<vmem>>, vector<1x8x128xf32>,
    %c8_i32 = arith.constant 8 : i32
    %c0_68 = arith.constant 0 : index
    %c0_69 = arith.constant 0 : index
    %182 = vector.load %arg3[%c0_68, %c0_69] : memref<8x128xf32, #tpu.memory_space<vmem>>, vector<8x128xf32>
    tpu.vector_store %arg3[%c0_68, %c0_69], %177 {strides = array<i32>} : memref<8x128xf32, #tpu.memory_space<vmem>>, vector<8x128xf32>,
    %c0_70 = arith.constant 0 : index
    %c0_71 = arith.constant 0 : index
    %183 = vector.load %arg4[%c0_70, %c0_71] : memref<8x128xf32, #tpu.memory_space<vmem>>, vector<8x128xf32>
    tpu.vector_store %arg4[%c0_70, %c0_71], %175 {strides = array<i32>} : memref<8x128xf32, #tpu.memory_space<vmem>>, vector<8x128xf32>,
    return
  }
}

</mosaic_0001>

<bundles_post_ra>
// kernel: tpu_custom_call.1
= control target key start
LH: loop header
LB: loop body
LE: loop exit
PB: predicated region body
PF: predicated region fallthrough
CT: control target
= control target key end

     0   :  { %10 = vsyncpa [#allocation3], 0  ;;  %s1939_s0 = inlined_call_operand.hbm [shape: f32[8,8,128], index: 0, kind: input, shape index: {}]   ;;  %s1940_s1 = inlined_call_operand.hbm [shape: f32[128,128], index: 1, kind: input, shape index: {}]   ;;  %s1941_s2 = inlined_call_operand.hbm [shape: f32[8,8,128], index: 2, kind: output, shape index: {0}]   ;;  %s1942_s3 = inlined_call_operand.hbm [shape: f32[8,128], index: 3, kind: output, shape index: {1}]   ;;  %s1943_s4 = inlined_call_operand.hbm [shape: f32[8,128], index: 4, kind: output, shape index: {2}]  }
   0x1   :  { %11 = vsyncpa [#allocation6], 0 }
   0x2   :  { %12 = vsyncpa [#allocation4], 0 }
   0x3   :  { %13 = vsyncpa [#allocation9], 0  ;;  %s1604_s15 = smov [#allocation2]   ;;  %s1486_s19 = scalar_lea.hbm %s1939_s0, 1024 }
   0x4   :  { %s19_s16 = sshll.u32 %s1604_s15, 4  ;;  %p1487_p0 = scmp.ne.s32.totalorder %s1939_s0, %s1486_s19  ;;  %s20_s16 = int_to_ptr.vmem [resolvable:$true] %s19_s16 }
   0x5   :  { %p1490_p1 = scmp.lt.u32.totalorder %s1486_s19, %s1939_s0 }
   0x7   :  { %p1492_p2 = pnand %p1490_p1, %p1487_p0 }
   0x9   :  { %1495 = shalt.err (!%p1492_p2)
}
   0xa   :  { %s1496_s24 = scalar_lea.vmem %s20_s16, 1024  ;;  %p1501_p4 = scmp.lt.s32.totalorder %s20_s16, %s20_s16 }
   0xb   :  { %p1497_p3 = scmp.ne.s32.totalorder %s20_s16, %s1496_s24  ;;  %p1502_p5 = scmp.lt.s32.totalorder %s1496_s24, %s1496_s24 }
   0xd   :  { %p1503_p6 = por %p1502_p5, %p1501_p4 }
   0xf   :  { %p1504_p7 = pnand %p1503_p6, %p1497_p3 }
  0x11   :  { %1507 = shalt.err (!%p1504_p7)
}
  0x12   :  { %s1605_s25 = smov 128   ;;  %s1606_s26 = smov 8  }
  0x13   :  { %25 = dma.hbm_to_vmem [thread:$0]  %s1939_s0, 1024, %s20_s16, [#allocation3], %s1605_s25, %s1605_s25, %s1606_s26  }
  0x14   :  { %s1607_s29 = smov [#allocation5]   ;;  %s1508_s7 = scalar_lea.hbm %s1940_s1, 2048 }
  0x15   :  { %s31_s30 = sshll.u32 %s1607_s29, 4  ;;  %p1509_p8 = scmp.ne.s32.totalorder %s1940_s1, %s1508_s7  ;;  %s32_s30 = int_to_ptr.vmem [resolvable:$true] %s31_s30 }
  0x16   :  { %p1512_p9 = scmp.lt.u32.totalorder %s1508_s7, %s1940_s1 }
  0x18   :  { %p1514_p10 = pnand %p1512_p9, %p1509_p8 }
  0x1a   :  { %1517 = shalt.err (!%p1514_p10)
}
  0x1b   :  { %s1518_s12 = scalar_lea.vmem %s32_s30, 2048  ;;  %p1523_p12 = scmp.lt.s32.totalorder %s32_s30, %s32_s30 }
  0x1c   :  { %p1519_p11 = scmp.ne.s32.totalorder %s32_s30, %s1518_s12  ;;  %p1524_p13 = scmp.lt.s32.totalorder %s1518_s12, %s1518_s12 }
  0x1e   :  { %p1525_p0 = por %p1524_p13, %p1523_p12 }
  0x20   :  { %p1526_p1 = pnand %p1525_p0, %p1519_p11 }
  0x22   :  { %1529 = shalt.err (!%p1526_p1)
}
  0x23   :  { %37 = dma.hbm_to_vmem [thread:$0]  %s1940_s1, 2048, %s32_s30, [#allocation6], %s1605_s25, %s1605_s25, %s1606_s26  }
  0x24   :  { %1596 = dma.done.wait [#allocation3], 1024  }
  0x25   :  { %1597 = vsyncadd [#allocation3], 4294966272 }
  0x26   :  { %1598 = dma.done.wait [#allocation6], 2048  }
  0x27   :  { %1599 = vsyncadd [#allocation6], 4294965248  ;;  %v1608_v0 = vmov 0.0|0.0   ;;  %vm1609_vm0 = vmmov 0   ;;  %v1610_v1 = vmov 0.0   ;;  %v44_v2 = vld [vmem:[#allocation5] sm:$0xff]  ;;  %v60_v26 = vlaneseq }
  0x28   :  { %1248 = vmatprep.subr.bf16.mxu0 %v1608_v0  ;;  %1000 = vmatprep.mubr.msk.f32.mxu0 %vm1609_vm0, %v1610_v1  ;;  %v45_v3 = vld [vmem:[#allocation5 + $0x8] sm:$0xff]  ;;  %v46_v4 = vld [vmem:[#allocation5 + $0x10] sm:$0xff]  ;;  %v47_v6 = vld [vmem:[#allocation5 + $0x18] sm:$0xff]  ;;  %v1611_v29 = vmov 0.5   ;;  %s1612_s1 = smov 32   ;;  %s1613_s14 = smov 96  }
  0x29   :  { %1272 = vmatprep.subr.bf16.mxu1 %v1608_v0  ;;  %1035 = vmatprep.mubr.msk.f32.mxu1 %vm1609_vm0, %v1610_v1  ;;  %v1679_v5 = vpack.c.bf16 %v45_v3, %v44_v2  ;;  %v1682_v7 = vpack.c.bf16 %v47_v6, %v46_v4  ;;  %v48_v8 = vld [vmem:[#allocation5 + $0x20] sm:$0xff]  ;;  %v49_v9 = vld [vmem:[#allocation5 + $0x28] sm:$0xff]  ;;  %v50_v11 = vld [vmem:[#allocation5 + $0x30] sm:$0xff]  ;;  %v61_v27 = vand.u32 127, %v60_v26  ;;  %s1614_s15 = smov 64   ;;  %s1615_s16 = smov [#allocation8]  }
  0x2a   :  { %v1688_v10 = vpack.c.bf16 %v49_v9, %v48_v8  ;;  %v51_v12 = vld [vmem:[#allocation5 + $0x38] sm:$0xff]  ;;  %v52_v14 = vld [vmem:[#allocation5 + $0x40] sm:$0xff]  ;;  %v53_v15 = vld [vmem:[#allocation5 + $0x48] sm:$0xff]  ;;  %s805_s17 = sshll.u32 %s1615_s16, 4  ;;  %s1616_s18 = smov [#allocation7]   ;;  %s806_s17 = int_to_ptr.vmem [resolvable:$true] %s805_s17 }
  0x2b   :  { %1250 = vmatpush3.bf16.msra.mxu0 %v1679_v5  ;;  %1274 = vmatpush3.bf16.msra.mxu1 %v1679_v5  ;;  %v1694_v13 = vpack.c.bf16 %v51_v12, %v50_v11  ;;  %v1700_v16 = vpack.c.bf16 %v53_v15, %v52_v14  ;;  %v54_v17 = vld [vmem:[#allocation5 + $0x50] sm:$0xff]  ;;  %v55_v18 = vld [vmem:[#allocation5 + $0x58] sm:$0xff]  ;;  %v56_v20 = vld [vmem:[#allocation5 + $0x60] sm:$0xff]  ;;  %vm62_vm1 = vcmp.ge.s32.totalorder %v61_v27, 64  ;;  %vm63_vm2 = vcmp.lt.s32.totalorder %v61_v27, 96  ;;  %s792_s19 = sshll.u32 %s1616_s18, 4  ;;  %p1535_p3 = scmp.lt.s32.totalorder %s806_s17, %s806_s17  ;;  %s1886_s19 = int_to_ptr.vmem [resolvable:$true] %s792_s19 }
  0x2c   :  { %1251 = vmatprep.subr.bf16.mxu0 %v1608_v0  ;;  %1275 = vmatprep.subr.bf16.mxu1 %v1608_v0  ;;  %v1706_v19 = vpack.c.bf16 %v55_v18, %v54_v17  ;;  %v57_v21 = vld [vmem:[#allocation5 + $0x68] sm:$0xff]  ;;  %v58_v23 = vld [vmem:[#allocation5 + $0x70] sm:$0xff]  ;;  %v59_v24 = vld [vmem:[#allocation5 + $0x78] sm:$0xff]  ;;  %s1617_s20 = smov [#allocation10]   ;;  %s1530_s22 = scalar_lea.vmem %s806_s17, 128 }
  0x2d   :  { %v1712_v22 = vpack.c.bf16 %v57_v21, %v56_v20  ;;  %v1718_v25 = vpack.c.bf16 %v59_v24, %v58_v23  ;;  %vm64_vm3 = vmand %vm62_vm1, %vm63_vm2  ;;  %v67_v28 = vld [vmem:[#allocation2] sm:$0xff]  ;;  %v156_v47 = vld [vmem:[#allocation2 + $0x8] sm:$0xff]  ;;  %s815_s21 = sshll.u32 %s1617_s20, 4  ;;  %p1531_p2 = scmp.ne.s32.totalorder %s806_s17, %s1530_s22  ;;  %s1888_s21 = int_to_ptr.vmem [resolvable:$true] %s815_s21 }
  0x2e   :  { %v1746_v30 = vsel %vm64_vm3, 1.0, %v1611_v29  ;;  %v1749_v36 = vsel %vm64_vm3, 0.0, %v1611_v29  ;;  %v246_v63 = vld [vmem:[#allocation2 + $0x10] sm:$0xff]  ;;  %v336_v24 = vld [vmem:[#allocation2 + $0x18] sm:$0xff]  ;;  %p1536_p4 = scmp.lt.s32.totalorder %s1530_s22, %s1530_s22 }
  0x2f   :  { %1253 = vmatpush3.bf16.msra.mxu0 %v1682_v7  ;;  %1277 = vmatpush3.bf16.msra.mxu1 %v1682_v7 }
  0x30   :  { %1254 = vmatprep.subr.bf16.mxu0 %v1608_v0  ;;  %1278 = vmatprep.subr.bf16.mxu1 %v1608_v0  ;;  %p1537_p5 = por %p1536_p4, %p1535_p3 }
  0x32   :  { %p1538_p6 = pnand %p1537_p5, %p1531_p2 }
  0x33   :  { %1256 = vmatpush3.bf16.msra.mxu0 %v1688_v10  ;;  %1280 = vmatpush3.bf16.msra.mxu1 %v1688_v10 }
  0x34   :  { %1257 = vmatprep.subr.bf16.mxu0 %v1608_v0  ;;  %1281 = vmatprep.subr.bf16.mxu1 %v1608_v0 }
  0x37   :  { %1259 = vmatpush3.bf16.msra.mxu0 %v1694_v13  ;;  %1283 = vmatpush3.bf16.msra.mxu1 %v1694_v13 }
  0x38   :  { %1260 = vmatprep.subr.bf16.mxu0 %v1608_v0  ;;  %1284 = vmatprep.subr.bf16.mxu1 %v1608_v0 }
  0x3b   :  { %1262 = vmatpush3.bf16.msra.mxu0 %v1700_v16  ;;  %1286 = vmatpush3.bf16.msra.mxu1 %v1700_v16 }
  0x3c   :  { %1263 = vmatprep.subr.bf16.mxu0 %v1608_v0  ;;  %1287 = vmatprep.subr.bf16.mxu1 %v1608_v0 }
  0x3f   :  { %1265 = vmatpush3.bf16.msra.mxu0 %v1706_v19  ;;  %1289 = vmatpush3.bf16.msra.mxu1 %v1706_v19 }
  0x40   :  { %1266 = vmatprep.subr.bf16.mxu0 %v1608_v0  ;;  %1290 = vmatprep.subr.bf16.mxu1 %v1608_v0 }
  0x43   :  { %1268 = vmatpush3.bf16.msra.mxu0 %v1712_v22  ;;  %1292 = vmatpush3.bf16.msra.mxu1 %v1712_v22 }
  0x44   :  { %1269 = vmatprep.subr.bf16.mxu0 %v1608_v0  ;;  %1293 = vmatprep.subr.bf16.mxu1 %v1608_v0 }
  0x47   :  { %1271 = vmatpush3.bf16.msra.mxu0 %v1718_v25  ;;  %1295 = vmatpush3.bf16.msra.mxu1 %v1718_v25 }
  0x48   :  { %1296 = vmatprep.subr.bf16.mxu0 %v1608_v0  ;;  %1320 = vmatprep.subr.bf16.mxu1 %v1608_v0 }
  0x4a   :  { %1001 = vmatmul.mubr.f32.vlgmr.msra.gmra.mrb[0].mxu0 %v1610_v1 }
  0x4b   :  { %1298 = vmatpush3.bf16.msra.mxu0 %v1679_v5  ;;  %1070 = vmatprep.mubr.msk.f32.mxu0 %vm1609_vm0, %v1610_v1 }
  0x4c   :  { %1299 = vmatprep.subr.bf16.mxu0 %v1608_v0 }
  0x4f   :  { %1301 = vmatpush3.bf16.msra.mxu0 %v1682_v7 }
  0x50   :  { %1302 = vmatprep.subr.bf16.mxu0 %v1608_v0 }
  0x53   :  { %1304 = vmatpush3.bf16.msra.mxu0 %v1688_v10 }
  0x54   :  { %1305 = vmatprep.subr.bf16.mxu0 %v1608_v0 }
  0x57   :  { %1307 = vmatpush3.bf16.msra.mxu0 %v1694_v13 }
  0x58   :  { %1308 = vmatprep.subr.bf16.mxu0 %v1608_v0 }
  0x5b   :  { %1310 = vmatpush3.bf16.msra.mxu0 %v1700_v16 }
  0x5c   :  { %1311 = vmatprep.subr.bf16.mxu0 %v1608_v0 }
  0x5f   :  { %1313 = vmatpush3.bf16.msra.mxu0 %v1706_v19 }
  0x60   :  { %1314 = vmatprep.subr.bf16.mxu0 %v1608_v0 }
  0x63   :  { %1316 = vmatpush3.bf16.msra.mxu0 %v1712_v22 }
  0x64   :  { %1317 = vmatprep.subr.bf16.mxu0 %v1608_v0 }
  0x67   :  { %1319 = vmatpush3.bf16.msra.mxu0 %v1718_v25 }
  0x68   :  { %1344 = vmatprep.subr.bf16.mxu0 %v1608_v0 }
 0x11d   :  { %v134_v31 = vpop.f32.mrb[0].mxu0 }
 0x11e   :  { %v138_v32 = vadd.f32 %v134_v31, %v67_v28  ;;  %v1002_v33 = vpop.f32.mrb[1].mxu0 }
 0x120   :  { %v139_v34 = vmul.f32 %v138_v32, %v1746_v30 }
 0x122   :  { %1454 = vtanh.f32 %v139_v34 }
 0x12c   :  { %v1455_v35 = vpop.eup %1454 }
 0x12d   :  { %v141_v37 = vmul.f32 %v1455_v35, %v1746_v30 }
 0x12f   :  { %v142_v38 = vadd.f32 %v141_v37, %v1749_v36 }
 0x131   :  { %147 = vrot.lane.b32.xlu1 %v142_v38, %s1612_s1  ;;  %143 = vrot.lane.b32.xlu0 %v142_v38, %s1613_s14 }
 0x135   :  { %145 = vrot.lane.b32.xlu0 %v142_v38, %s1614_s15 }
 0x1a3   :  { %v144_v39 = vpop.permute.xlu0 %143  ;;  %v148_v45 = vpop.permute.xlu1 %147 }
 0x1a4   :  { %v149_v41 = vmul.f32 0.0, %v144_v39 }
 0x1a7   :  { %v146_v40 = vpop.permute.xlu0 %145 }
 0x1a8   :  { %v150_v42 = vmul.f32 %v146_v40, %v142_v38 }
 0x1aa   :  { %v151_v43 = vadd.f32 %v150_v42, %v149_v41 }
 0x1ac   :  { %1456 = vtanh.f32 %v151_v43 }
 0x1b6   :  { %v1457_v44 = vpop.eup %1456 }
 0x1b7   :  { %v153_v46 = vmul.f32 %v1457_v44, %v148_v45 }
 0x1b9   :  { %154 = vst [vmem:[#allocation7] sm:$0xff] %v153_v46  ;;  %1036 = vmatmul.mubr.f32.vlgmr.msra.gmra.mrb[0].mxu1 %v153_v46 }
 0x1ba   :  { %1322 = vmatpush3.bf16.msra.mxu1 %v1679_v5  ;;  %1105 = vmatprep.mubr.msk.f32.mxu1 %vm1609_vm0, %v1610_v1 }
 0x1bb   :  { %1323 = vmatprep.subr.bf16.mxu1 %v1608_v0 }
 0x1be   :  { %1325 = vmatpush3.bf16.msra.mxu1 %v1682_v7 }
 0x1bf   :  { %1326 = vmatprep.subr.bf16.mxu1 %v1608_v0 }
 0x1c2   :  { %1328 = vmatpush3.bf16.msra.mxu1 %v1688_v10 }
 0x1c3   :  { %1329 = vmatprep.subr.bf16.mxu1 %v1608_v0 }
 0x1c6   :  { %1331 = vmatpush3.bf16.msra.mxu1 %v1694_v13 }
 0x1c7   :  { %1332 = vmatprep.subr.bf16.mxu1 %v1608_v0 }
 0x1ca   :  { %1334 = vmatpush3.bf16.msra.mxu1 %v1700_v16 }
 0x1cb   :  { %1335 = vmatprep.subr.bf16.mxu1 %v1608_v0 }
 0x1ce   :  { %1337 = vmatpush3.bf16.msra.mxu1 %v1706_v19 }
 0x1cf   :  { %1338 = vmatprep.subr.bf16.mxu1 %v1608_v0 }
 0x1d2   :  { %1340 = vmatpush3.bf16.msra.mxu1 %v1712_v22 }
 0x1d3   :  { %1341 = vmatprep.subr.bf16.mxu1 %v1608_v0 }
 0x1d6   :  { %1343 = vmatpush3.bf16.msra.mxu1 %v1718_v25 }
 0x1d7   :  { %1368 = vmatprep.subr.bf16.mxu1 %v1608_v0 }
 0x28c   :  { %v223_v48 = vpop.f32.mrb[0].mxu1 }
 0x28d   :  { %v227_v49 = vadd.f32 %v223_v48, %v156_v47  ;;  %v1037_v50 = vpop.f32.mrb[1].mxu1 }
 0x28f   :  { %v228_v51 = vmul.f32 %v227_v49, %v1746_v30 }
 0x291   :  { %1458 = vtanh.f32 %v228_v51 }
 0x29b   :  { %v1459_v52 = vpop.eup %1458 }
 0x29c   :  { %v230_v53 = vmul.f32 %v1459_v52, %v1746_v30 }
 0x29e   :  { %v231_v54 = vadd.f32 %v230_v53, %v1749_v36 }
 0x2a0   :  { %234 = vrot.lane.b32.xlu0 %v231_v54, %s1614_s15  ;;  %232 = vrot.lane.b32.xlu1 %v231_v54, %s1613_s14 }
 0x2a4   :  { %236 = vrot.lane.b32.xlu1 %v231_v54, %s1612_s1 }
 0x312   :  { %v235_v55 = vpop.permute.xlu0 %234  ;;  %v233_v56 = vpop.permute.xlu1 %232 }
 0x313   :  { %v239_v57 = vmul.f32 %v235_v55, %v231_v54  ;;  %v238_v58 = vmul.f32 %v233_v56, %v151_v43  ;;  %v426_v43 = vld [vmem:[#allocation2 + $0x20] sm:$0xff] }
 0x315   :  { %v240_v59 = vadd.f32 %v239_v57, %v238_v58 }
 0x316   :  { %v237_v61 = vpop.permute.xlu1 %236 }
 0x317   :  { %1460 = vtanh.f32 %v240_v59 }
 0x321   :  { %v1461_v60 = vpop.eup %1460 }
 0x322   :  { %v242_v62 = vmul.f32 %v1461_v60, %v237_v61 }
 0x324   :  { %244 = vst [vmem:[#allocation7 + $0x8] sm:$0xff] %v242_v62  ;;  %1071 = vmatmul.mubr.f32.vlgmr.msra.gmra.mrb[2].mxu0 %v242_v62 }
 0x325   :  { %1346 = vmatpush3.bf16.msra.mxu0 %v1679_v5  ;;  %1140 = vmatprep.mubr.msk.f32.mxu0 %vm1609_vm0, %v1610_v1 }
 0x326   :  { %1347 = vmatprep.subr.bf16.mxu0 %v1608_v0 }
 0x329   :  { %1349 = vmatpush3.bf16.msra.mxu0 %v1682_v7 }
 0x32a   :  { %1350 = vmatprep.subr.bf16.mxu0 %v1608_v0 }
 0x32d   :  { %1352 = vmatpush3.bf16.msra.mxu0 %v1688_v10 }
 0x32e   :  { %1353 = vmatprep.subr.bf16.mxu0 %v1608_v0 }
 0x331   :  { %1355 = vmatpush3.bf16.msra.mxu0 %v1694_v13 }
 0x332   :  { %1356 = vmatprep.subr.bf16.mxu0 %v1608_v0 }
 0x335   :  { %1358 = vmatpush3.bf16.msra.mxu0 %v1700_v16 }
 0x336   :  { %1359 = vmatprep.subr.bf16.mxu0 %v1608_v0 }
 0x339   :  { %1361 = vmatpush3.bf16.msra.mxu0 %v1706_v19 }
 0x33a   :  { %1362 = vmatprep.subr.bf16.mxu0 %v1608_v0 }
 0x33d   :  { %1364 = vmatpush3.bf16.msra.mxu0 %v1712_v22 }
 0x33e   :  { %1365 = vmatprep.subr.bf16.mxu0 %v1608_v0 }
 0x341   :  { %1367 = vmatpush3.bf16.msra.mxu0 %v1718_v25 }
 0x342   :  { %1392 = vmatprep.subr.bf16.mxu0 %v1608_v0 }
 0x3f7   :  { %v313_v2 = vpop.f32.mrb[2].mxu0 }
 0x3f8   :  { %v317_v3 = vadd.f32 %v313_v2, %v246_v63  ;;  %v1072_v4 = vpop.f32.mrb[3].mxu0 }
 0x3fa   :  { %v318_v6 = vmul.f32 %v317_v3, %v1746_v30  ;;  %v606_v3 = vld [vmem:[#allocation2 + $0x30] sm:$0xff] }
 0x3fc   :  { %1462 = vtanh.f32 %v318_v6 }
 0x406   :  { %v1463_v8 = vpop.eup %1462 }
 0x407   :  { %v320_v9 = vmul.f32 %v1463_v8, %v1746_v30 }
 0x409   :  { %v321_v11 = vadd.f32 %v320_v9, %v1749_v36 }
 0x40b   :  { %324 = vrot.lane.b32.xlu1 %v321_v11, %s1614_s15  ;;  %322 = vrot.lane.b32.xlu0 %v321_v11, %s1613_s14 }
 0x40f   :  { %326 = vrot.lane.b32.xlu0 %v321_v11, %s1612_s1 }
 0x47d   :  { %v325_v12 = vpop.permute.xlu1 %324  ;;  %v323_v14 = vpop.permute.xlu0 %322 }
 0x47e   :  { %v329_v15 = vmul.f32 %v325_v12, %v321_v11  ;;  %v328_v17 = vmul.f32 %v323_v14, %v240_v59 }
 0x480   :  { %v330_v18 = vadd.f32 %v329_v15, %v328_v17 }
 0x481   :  { %v327_v21 = vpop.permute.xlu0 %326 }
 0x482   :  { %1464 = vtanh.f32 %v330_v18 }
 0x48c   :  { %v1465_v20 = vpop.eup %1464 }
 0x48d   :  { %v332_v23 = vmul.f32 %v1465_v20, %v327_v21 }
 0x48f   :  { %334 = vst [vmem:[#allocation7 + $0x10] sm:$0xff] %v332_v23  ;;  %1106 = vmatmul.mubr.f32.vlgmr.msra.gmra.mrb[2].mxu1 %v332_v23 }
 0x490   :  { %1370 = vmatpush3.bf16.msra.mxu1 %v1679_v5  ;;  %1175 = vmatprep.mubr.msk.f32.mxu1 %vm1609_vm0, %v1610_v1 }
 0x491   :  { %1371 = vmatprep.subr.bf16.mxu1 %v1608_v0 }
 0x494   :  { %1373 = vmatpush3.bf16.msra.mxu1 %v1682_v7 }
 0x495   :  { %1374 = vmatprep.subr.bf16.mxu1 %v1608_v0 }
 0x498   :  { %1376 = vmatpush3.bf16.msra.mxu1 %v1688_v10 }
 0x499   :  { %1377 = vmatprep.subr.bf16.mxu1 %v1608_v0 }
 0x49c   :  { %1379 = vmatpush3.bf16.msra.mxu1 %v1694_v13 }
 0x49d   :  { %1380 = vmatprep.subr.bf16.mxu1 %v1608_v0 }
 0x4a0   :  { %1382 = vmatpush3.bf16.msra.mxu1 %v1700_v16 }
 0x4a1   :  { %1383 = vmatprep.subr.bf16.mxu1 %v1608_v0 }
 0x4a4   :  { %1385 = vmatpush3.bf16.msra.mxu1 %v1706_v19 }
 0x4a5   :  { %1386 = vmatprep.subr.bf16.mxu1 %v1608_v0 }
 0x4a8   :  { %1388 = vmatpush3.bf16.msra.mxu1 %v1712_v22 }
 0x4a9   :  { %1389 = vmatprep.subr.bf16.mxu1 %v1608_v0 }
 0x4ac   :  { %1391 = vmatpush3.bf16.msra.mxu1 %v1718_v25 }
 0x4ad   :  { %1416 = vmatprep.subr.bf16.mxu1 %v1608_v0 }
 0x562   :  { %v403_v26 = vpop.f32.mrb[2].mxu1 }
 0x563   :  { %v407_v27 = vadd.f32 %v403_v26, %v336_v24  ;;  %v1107_v28 = vpop.f32.mrb[3].mxu1 }
 0x565   :  { %v408_v29 = vmul.f32 %v407_v27, %v1746_v30  ;;  %v696_v27 = vld [vmem:[#allocation2 + $0x38] sm:$0xff] }
 0x567   :  { %1466 = vtanh.f32 %v408_v29 }
 0x571   :  { %v1467_v31 = vpop.eup %1466 }
 0x572   :  { %v410_v32 = vmul.f32 %v1467_v31, %v1746_v30 }
 0x574   :  { %v411_v33 = vadd.f32 %v410_v32, %v1749_v36 }
 0x576   :  { %414 = vrot.lane.b32.xlu0 %v411_v33, %s1614_s15  ;;  %412 = vrot.lane.b32.xlu1 %v411_v33, %s1613_s14 }
 0x57a   :  { %416 = vrot.lane.b32.xlu1 %v411_v33, %s1612_s1 }
 0x5e8   :  { %v415_v34 = vpop.permute.xlu0 %414  ;;  %v413_v35 = vpop.permute.xlu1 %412 }
 0x5e9   :  { %v419_v37 = vmul.f32 %v415_v34, %v411_v33  ;;  %v418_v38 = vmul.f32 %v413_v35, %v330_v18 }
 0x5eb   :  { %v420_v39 = vadd.f32 %v419_v37, %v418_v38 }
 0x5ec   :  { %v417_v41 = vpop.permute.xlu1 %416 }
 0x5ed   :  { %1468 = vtanh.f32 %v420_v39 }
 0x5f7   :  { %v1469_v40 = vpop.eup %1468 }
 0x5f8   :  { %v422_v42 = vmul.f32 %v1469_v40, %v417_v41 }
 0x5fa   :  { %424 = vst [vmem:[#allocation7 + $0x18] sm:$0xff] %v422_v42  ;;  %1141 = vmatmul.mubr.f32.vlgmr.msra.gmra.mrb[4].mxu0 %v422_v42 }
 0x5fb   :  { %1394 = vmatpush3.bf16.msra.mxu0 %v1679_v5  ;;  %1210 = vmatprep.mubr.msk.f32.mxu0 %vm1609_vm0, %v1610_v1 }
 0x5fc   :  { %1395 = vmatprep.subr.bf16.mxu0 %v1608_v0 }
 0x5ff   :  { %1397 = vmatpush3.bf16.msra.mxu0 %v1682_v7 }
 0x600   :  { %1398 = vmatprep.subr.bf16.mxu0 %v1608_v0 }
 0x603   :  { %1400 = vmatpush3.bf16.msra.mxu0 %v1688_v10 }
 0x604   :  { %1401 = vmatprep.subr.bf16.mxu0 %v1608_v0 }
 0x607   :  { %1403 = vmatpush3.bf16.msra.mxu0 %v1694_v13 }
 0x608   :  { %1404 = vmatprep.subr.bf16.mxu0 %v1608_v0 }
 0x60b   :  { %1406 = vmatpush3.bf16.msra.mxu0 %v1700_v16 }
 0x60c   :  { %1407 = vmatprep.subr.bf16.mxu0 %v1608_v0 }
 0x60f   :  { %1409 = vmatpush3.bf16.msra.mxu0 %v1706_v19 }
 0x610   :  { %1410 = vmatprep.subr.bf16.mxu0 %v1608_v0 }
 0x613   :  { %1412 = vmatpush3.bf16.msra.mxu0 %v1712_v22 }
 0x614   :  { %1413 = vmatprep.subr.bf16.mxu0 %v1608_v0 }
 0x617   :  { %1415 = vmatpush3.bf16.msra.mxu0 %v1718_v25 }
 0x6cd   :  { %v493_v44 = vpop.f32.mrb[4].mxu0 }
 0x6ce   :  { %v497_v45 = vadd.f32 %v493_v44, %v426_v43  ;;  %v1142_v46 = vpop.f32.mrb[5].mxu0 }
 0x6d0   :  { %v498_v47 = vmul.f32 %v497_v45, %v1746_v30 }
 0x6d2   :  { %1470 = vtanh.f32 %v498_v47 }
 0x6dc   :  { %v1471_v48 = vpop.eup %1470 }
 0x6dd   :  { %v500_v49 = vmul.f32 %v1471_v48, %v1746_v30 }
 0x6df   :  { %v501_v50 = vadd.f32 %v500_v49, %v1749_v36 }
 0x6e1   :  { %504 = vrot.lane.b32.xlu1 %v501_v50, %s1614_s15  ;;  %502 = vrot.lane.b32.xlu0 %v501_v50, %s1613_s14 }
 0x6e5   :  { %506 = vrot.lane.b32.xlu0 %v501_v50, %s1612_s1 }
 0x753   :  { %v505_v51 = vpop.permute.xlu1 %504  ;;  %v503_v52 = vpop.permute.xlu0 %502 }
 0x754   :  { %v509_v53 = vmul.f32 %v505_v51, %v501_v50  ;;  %v508_v54 = vmul.f32 %v503_v52, %v420_v39 }
 0x756   :  { %v510_v55 = vadd.f32 %v509_v53, %v508_v54 }
 0x757   :  { %v507_v57 = vpop.permute.xlu0 %506 }
 0x758   :  { %1472 = vtanh.f32 %v510_v55 }
 0x762   :  { %v1473_v56 = vpop.eup %1472 }
 0x763   :  { %v512_v58 = vmul.f32 %v1473_v56, %v507_v57 }
 0x765   :  { %514 = vst [vmem:[#allocation7 + $0x20] sm:$0xff] %v512_v58  ;;  %1176 = vmatmul.mubr.f32.vlgmr.msra.gmra.mrb[4].mxu1 %v512_v58 }
 0x766   :  { %1418 = vmatpush3.bf16.msra.mxu1 %v1679_v5  ;;  %1245 = vmatprep.mubr.msk.f32.mxu1 %vm1609_vm0, %v1610_v1  ;;  %v516_v1 = vld [vmem:[#allocation2 + $0x28] sm:$0xff] }
 0x767   :  { %1419 = vmatprep.subr.bf16.mxu1 %v1608_v0 }
 0x76a   :  { %1421 = vmatpush3.bf16.msra.mxu1 %v1682_v7 }
 0x76b   :  { %1422 = vmatprep.subr.bf16.mxu1 %v1608_v0 }
 0x76e   :  { %1424 = vmatpush3.bf16.msra.mxu1 %v1688_v10 }
 0x76f   :  { %1425 = vmatprep.subr.bf16.mxu1 %v1608_v0 }
 0x772   :  { %1427 = vmatpush3.bf16.msra.mxu1 %v1694_v13 }
 0x773   :  { %1428 = vmatprep.subr.bf16.mxu1 %v1608_v0 }
 0x776   :  { %1430 = vmatpush3.bf16.msra.mxu1 %v1700_v16 }
 0x777   :  { %1431 = vmatprep.subr.bf16.mxu1 %v1608_v0 }
 0x77a   :  { %1433 = vmatpush3.bf16.msra.mxu1 %v1706_v19 }
 0x77b   :  { %1434 = vmatprep.subr.bf16.mxu1 %v1608_v0 }
 0x77e   :  { %1436 = vmatpush3.bf16.msra.mxu1 %v1712_v22 }
 0x77f   :  { %1437 = vmatprep.subr.bf16.mxu1 %v1608_v0 }
 0x782   :  { %1439 = vmatpush3.bf16.msra.mxu1 %v1718_v25 }
 0x838   :  { %v583_v5 = vpop.f32.mrb[4].mxu1 }
 0x839   :  { %v587_v7 = vadd.f32 %v583_v5, %v516_v1  ;;  %v1177_v10 = vpop.f32.mrb[5].mxu1 }
 0x83b   :  { %v588_v13 = vmul.f32 %v587_v7, %v1746_v30 }
 0x83d   :  { %1474 = vtanh.f32 %v588_v13 }
 0x847   :  { %v1475_v16 = vpop.eup %1474 }
 0x848   :  { %v590_v59 = vmul.f32 %v1475_v16, %v1746_v30 }
 0x84a   :  { %v591_v19 = vadd.f32 %v590_v59, %v1749_v36 }
 0x84c   :  { %594 = vrot.lane.b32.xlu0 %v591_v19, %s1614_s15  ;;  %592 = vrot.lane.b32.xlu1 %v591_v19, %s1613_s14 }
 0x850   :  { %596 = vrot.lane.b32.xlu1 %v591_v19, %s1612_s1 }
 0x8be   :  { %v595_v0 = vpop.permute.xlu0 %594  ;;  %v593_v22 = vpop.permute.xlu1 %592 }
 0x8bf   :  { %v599_v25 = vmul.f32 %v595_v0, %v591_v19  ;;  %v598_v60 = vmul.f32 %v593_v22, %v510_v55 }
 0x8c1   :  { %v600_v61 = vadd.f32 %v599_v25, %v598_v60 }
 0x8c2   :  { %v597_v63 = vpop.permute.xlu1 %596 }
 0x8c3   :  { %1476 = vtanh.f32 %v600_v61 }
 0x8cd   :  { %v1477_v62 = vpop.eup %1476 }
 0x8ce   :  { %v602_v2 = vmul.f32 %v1477_v62, %v597_v63 }
 0x8d0   :  { %604 = vst [vmem:[#allocation7 + $0x28] sm:$0xff] %v602_v2  ;;  %1211 = vmatmul.mubr.f32.vlgmr.msra.gmra.mrb[6].mxu0 %v602_v2 }
 0x9a3   :  { %v673_v4 = vpop.f32.mrb[6].mxu0 }
 0x9a4   :  { %v677_v6 = vadd.f32 %v673_v4, %v606_v3  ;;  %v1212_v8 = vpop.f32.mrb[7].mxu0 }
 0x9a6   :  { %v678_v9 = vmul.f32 %v677_v6, %v1746_v30 }
 0x9a8   :  { %1478 = vtanh.f32 %v678_v9 }
 0x9b2   :  { %v1479_v11 = vpop.eup %1478 }
 0x9b3   :  { %v680_v12 = vmul.f32 %v1479_v11, %v1746_v30 }
 0x9b5   :  { %v681_v14 = vadd.f32 %v680_v12, %v1749_v36 }
 0x9b7   :  { %684 = vrot.lane.b32.xlu1 %v681_v14, %s1614_s15  ;;  %682 = vrot.lane.b32.xlu0 %v681_v14, %s1613_s14 }
 0x9bb   :  { %686 = vrot.lane.b32.xlu0 %v681_v14, %s1612_s1 }
 0xa29   :  { %v685_v15 = vpop.permute.xlu1 %684  ;;  %v683_v17 = vpop.permute.xlu0 %682 }
 0xa2a   :  { %v689_v18 = vmul.f32 %v685_v15, %v681_v14  ;;  %v688_v20 = vmul.f32 %v683_v17, %v600_v61 }
 0xa2c   :  { %v690_v21 = vadd.f32 %v689_v18, %v688_v20 }
 0xa2d   :  { %v687_v24 = vpop.permute.xlu0 %686 }
 0xa2e   :  { %1480 = vtanh.f32 %v690_v21 }
 0xa38   :  { %v1481_v23 = vpop.eup %1480 }
 0xa39   :  { %v692_v26 = vmul.f32 %v1481_v23, %v687_v24 }
 0xa3b   :  { %694 = vst [vmem:[#allocation7 + $0x30] sm:$0xff] %v692_v26  ;;  %1246 = vmatmul.mubr.f32.vlgmr.msra.gmra.mrb[6].mxu1 %v692_v26 }
 0xb0e   :  { %v763_v28 = vpop.f32.mrb[6].mxu1 }
 0xb0f   :  { %v767_v29 = vadd.f32 %v763_v28, %v696_v27  ;;  %v1247_v31 = vpop.f32.mrb[7].mxu1 }
 0xb11   :  { %v768_v32 = vmul.f32 %v767_v29, %v1746_v30 }
 0xb13   :  { %1482 = vtanh.f32 %v768_v32 }
 0xb1d   :  { %v1483_v33 = vpop.eup %1482 }
 0xb1e   :  { %v770_v34 = vmul.f32 %v1483_v33, %v1746_v30 }
 0xb20   :  { %v771_v35 = vadd.f32 %v770_v34, %v1749_v36 }
 0xb22   :  { %774 = vrot.lane.b32.xlu0 %v771_v35, %s1614_s15  ;;  %772 = vrot.lane.b32.xlu1 %v771_v35, %s1613_s14 }
 0xb26   :  { %776 = vrot.lane.b32.xlu1 %v771_v35, %s1612_s1 }
 0xb94   :  { %v775_v37 = vpop.permute.xlu0 %774  ;;  %v773_v38 = vpop.permute.xlu1 %772 }
 0xb95   :  { %v779_v39 = vmul.f32 %v775_v37, %v771_v35  ;;  %v778_v40 = vmul.f32 %v773_v38, %v690_v21 }
 0xb97   :  { %v780_v41 = vadd.f32 %v779_v39, %v778_v40 }
 0xb98   :  { %v777_v42 = vpop.permute.xlu1 %776 }
 0xb99   :  { %1484 = vtanh.f32 %v780_v41  ;;  %786 = vst [vmem:[#allocation10] sm:$0xff] %v780_v41 }
 0xba3   :  { %v1485_v30 = vpop.eup %1484 }
 0xba4   :  { %v782_v36 = vmul.f32 %v1485_v30, %v777_v42 }
 0xba6   :  { %784 = vst [vmem:[#allocation7 + $0x38] sm:$0xff] %v782_v36  ;;  %785 = vst [vmem:[#allocation8] sm:$0xff] %v782_v36 }
 0xba7   :  { %1541 = shalt.err (!%p1538_p6)
}
 0xba8   :  { %s1542_s27 = scalar_lea.hbm %s1942_s3, 128 }
 0xba9   :  { %p1543_p7 = scmp.ne.s32.totalorder %s1942_s3, %s1542_s27  ;;  %p1546_p8 = scmp.lt.u32.totalorder %s1542_s27, %s1942_s3 }
 0xbab   :  { %p1548_p9 = pnand %p1546_p8, %p1543_p7 }
 0xbad   :  { %1551 = shalt.err (!%p1548_p9)
}
 0xbae   :  { %808 = dma.vmem_to_hbm [thread:$0]  %s806_s17, 128, %s1942_s3, [#allocation9]  }
 0xbaf   :  { %s1552_s8 = scalar_lea.vmem %s1886_s19, 1024  ;;  %p1557_p11 = scmp.lt.s32.totalorder %s1886_s19, %s1886_s19 }
 0xbb0   :  { %p1553_p10 = scmp.ne.s32.totalorder %s1886_s19, %s1552_s8  ;;  %p1558_p12 = scmp.lt.s32.totalorder %s1552_s8, %s1552_s8 }
 0xbb2   :  { %p1559_p13 = por %p1558_p12, %p1557_p11 }
 0xbb4   :  { %p1560_p0 = pnand %p1559_p13, %p1553_p10 }
 0xbb6   :  { %1563 = shalt.err (!%p1560_p0)
}
 0xbb7   :  { %s1564_s11 = scalar_lea.hbm %s1941_s2, 1024 }
 0xbb8   :  { %p1565_p1 = scmp.ne.s32.totalorder %s1941_s2, %s1564_s11  ;;  %p1568_p2 = scmp.lt.u32.totalorder %s1564_s11, %s1941_s2 }
 0xbba   :  { %p1570_p3 = pnand %p1568_p2, %p1565_p1 }
 0xbbc   :  { %1573 = shalt.err (!%p1570_p3)
}
 0xbbd   :  { %798 = dma.vmem_to_hbm [thread:$0]  %s1886_s19, 1024, %s1941_s2, [#allocation4], %s1605_s25, %s1605_s25, %s1606_s26  }
 0xbbe   :  { %s1574_s15 = scalar_lea.vmem %s1888_s21, 128  ;;  %p1579_p5 = scmp.lt.s32.totalorder %s1888_s21, %s1888_s21 }
 0xbbf   :  { %p1575_p4 = scmp.ne.s32.totalorder %s1888_s21, %s1574_s15  ;;  %p1580_p6 = scmp.lt.s32.totalorder %s1574_s15, %s1574_s15 }
 0xbc1   :  { %p1581_p7 = por %p1580_p6, %p1579_p5 }
 0xbc3   :  { %p1582_p8 = pnand %p1581_p7, %p1575_p4 }
 0xbc5   :  { %1585 = shalt.err (!%p1582_p8)
}
 0xbc6   :  { %s1586_s18 = scalar_lea.hbm %s1943_s4, 128 }
 0xbc7   :  { %p1587_p9 = scmp.ne.s32.totalorder %s1943_s4, %s1586_s18  ;;  %p1590_p10 = scmp.lt.u32.totalorder %s1586_s18, %s1943_s4 }
 0xbc9   :  { %p1592_p11 = pnand %p1590_p10, %p1587_p9 }
 0xbcb   :  { %1595 = shalt.err (!%p1592_p11)
}
 0xbcc   :  { %818 = dma.vmem_to_hbm [thread:$0]  %s1888_s21, 128, %s1943_s4, [#allocation9]  }
 0xbcd   :  { %1600 = dma.done.wait [#allocation4], 1024  }
 0xbce   :  { %1601 = vsyncadd [#allocation4], 4294966272 }
 0xbcf   :  { %1602 = dma.done.wait [#allocation9], 256  }
 0xbd0   :  { %1603 = vsyncadd [#allocation9], 4294967040 }
 0xbd1   :  { %828 = vsyncpa [#allocation3], 1 }
 0xbd2   :  { %829 = vsyncpa [#allocation6], 1 }
 0xbd3   :  { %830 = vsyncpa [#allocation4], 1 }
 0xbd4   :  { %831 = vsyncpa [#allocation9], 1 }

</bundles_post_ra>
